<compile_context>
chip_gen: v6e
topology: v6e:2x2x1
jax: 0.10.0
libtpu: 0.0.40
codegen_flags: <defaults>
</compile_context>

<pallas_src>
import jax
import jax.numpy as jnp
from jax.experimental import pallas as pl
from jax.experimental.pallas import tpu as pltpu


def _round_up(n, m):
    return ((n + m - 1) // m) * m


def ffn_kernel(x_ref, w1_ref, b1_ref, w2_ref, b2_ref, o_ref, acc_ref):
    # x_ref:  (tm, Ep)  bf16      w1_ref: (Ep, th) bf16   b1_ref: (1, th) f32
    # w2_ref: (th, Ep)  bf16      b2_ref: (1, Ep)  f32
    # o_ref:  (tm, Ep)  f32       acc_ref: (tm, Ep) f32 scratch
    k = pl.program_id(1)

    @pl.when(k == 0)
    def _():
        # Fold the output bias into the accumulator init (no per-step broadcast).
        acc_ref[...] = jnp.broadcast_to(b2_ref[...], acc_ref.shape)

    # First matmul on the MXU (bf16 in, f32 accumulate), bias + ReLU in f32.
    h = jnp.dot(x_ref[...], w1_ref[...], preferred_element_type=jnp.float32)
    h = jnp.maximum(h + b1_ref[...], 0.0)

    # Second matmul: accumulate this hidden-tile's contribution.
    acc_ref[...] += jnp.dot(h.astype(jnp.bfloat16), w2_ref[...],
                            preferred_element_type=jnp.float32)

    @pl.when(k == pl.num_programs(1) - 1)
    def _():
        o_ref[...] = acc_ref[...].astype(o_ref.dtype)  # Dropout(eval) = identity


def feed_forward(x, w1, b1, w2, b2, *, tile_m=256, tile_h=512):
    """x: (B, T, E) float32. Weights stored as (in, out). Returns (B, T, E) float32."""
    B, T, E = x.shape
    H = w1.shape[1]  # 4 * E
    M = B * T

    # Lane-dense padding: E, H -> multiples of 128; H additionally a multiple of tile_h.
    Ep = _round_up(E, 128)
    tile_h = min(tile_h, _round_up(H, 128))
    Hp = _round_up(_round_up(H, 128), tile_h)

    # Row tiling: multiple of 8 (f32 sublane), divides padded M exactly.
    tile_m = min(tile_m, _round_up(M, 8))
    Mp = _round_up(M, tile_m)

    x2 = jnp.pad(x.reshape(M, E), ((0, Mp - M), (0, Ep - E))).astype(jnp.bfloat16)
    w1p = jnp.pad(w1, ((0, Ep - E), (0, Hp - H))).astype(jnp.bfloat16)
    b1p = jnp.pad(b1, ((0, 0), (0, Hp - H))).astype(jnp.float32)
    w2p = jnp.pad(w2, ((0, Hp - H), (0, Ep - E))).astype(jnp.bfloat16)
    b2p = jnp.pad(b2, ((0, 0), (0, Ep - E))).astype(jnp.float32)

    grid = (Mp // tile_m, Hp // tile_h)

    # VMEM budget (double-buffered inputs/outputs + scratch + intermediates), +50% headroom,
    # clamped so it fits every generation's physical VMEM (v7x: 64 MiB per TC).
    vmem_budget = (
        2 * tile_m * Ep * 2          # x tile (bf16), double-buffered
        + 2 * Ep * tile_h * 2        # W1 tile (bf16)
        + 2 * tile_h * Ep * 2        # W2 tile (bf16)
        + 2 * 8 * tile_h * 4         # b1 (sublane-padded, f32)
        + 2 * 8 * Ep * 4             # b2
        + 2 * tile_m * Ep * 4        # output tile (f32)
        + tile_m * Ep * 4            # accumulator scratch
        + 2 * tile_m * tile_h * 4    # hidden intermediate + temporaries
    )
    vmem_limit = min(max(int(vmem_budget * 1.5), 16 * 1024 * 1024), 64 * 1024 * 1024)

    cost = pl.CostEstimate(
        flops=4 * Mp * Ep * Hp,  # 2*M*E*H per matmul, two matmuls
        transcendentals=0,
        bytes_accessed=(x2.size * 2 + w1p.size * 2 + w2p.size * 2
                        + b1p.size * 4 + b2p.size * 4 + Mp * Ep * 4),
    )

    out2 = pl.pallas_call(
        ffn_kernel,
        out_shape=jax.ShapeDtypeStruct((Mp, Ep), x.dtype),
        grid_spec=pltpu.PrefetchScalarGridSpec(
            num_scalar_prefetch=0,
            grid=grid,
            in_specs=[
                pl.BlockSpec((tile_m, Ep), lambda i, k: (i, 0)),  # x rows
                pl.BlockSpec((Ep, tile_h), lambda i, k: (0, k)),  # W1 hidden-tile
                pl.BlockSpec((1, tile_h),  lambda i, k: (0, k)),  # b1 hidden-tile
                pl.BlockSpec((tile_h, Ep), lambda i, k: (k, 0)),  # W2 hidden-tile
                pl.BlockSpec((1, Ep),      lambda i, k: (0, 0)),  # b2 (resident)
            ],
            out_specs=pl.BlockSpec((tile_m, Ep), lambda i, k: (i, 0)),
            scratch_shapes=[pltpu.VMEM((tile_m, Ep), jnp.float32)],
        ),
        compiler_params=pltpu.CompilerParams(
            dimension_semantics=("parallel", "arbitrary"),
            vmem_limit_bytes=vmem_limit,
        ),
        cost_estimate=cost,
    )(x2, w1p, b1p, w2p, b2p)

    return out2[:M, :E].reshape(B, T, E)


def init_params(key, embed_size):
    """Deterministic PyTorch-style Linear init (U[-1/sqrt(fan_in), 1/sqrt(fan_in)])."""
    hidden = 4 * embed_size
    k1, k2, k3, k4 = jax.random.split(key, 4)
    lim1 = 1.0 / jnp.sqrt(embed_size)
    lim2 = 1.0 / jnp.sqrt(hidden)
    # stored as (in, out) == transpose of torch's (out, in) weight
    w1 = jax.random.uniform(k1, (embed_size, hidden), jnp.float32, -lim1, lim1)
    b1 = jax.random.uniform(k2, (1, hidden), jnp.float32, -lim1, lim1)
    w2 = jax.random.uniform(k3, (hidden, embed_size), jnp.float32, -lim2, lim2)
    b2 = jax.random.uniform(k4, (1, embed_size), jnp.float32, -lim2, lim2)
    return w1, b1, w2, b2


if __name__ == "__main__":
    key = jax.random.PRNGKey(0)
    B, T, E = 2, 8, 32                    # batch=2, seq=8, embed_size=32
    kx, kp = jax.random.split(key)
    x = jax.random.normal(kx, (B, T, E), jnp.float32)
    w1, b1, w2, b2 = init_params(kp, E)

    out = feed_forward(x, w1, b1, w2, b2)
    out = jax.block_until_ready(out)

    # reference check in plain JAX (f32); kernel uses bf16 matmuls -> relaxed tolerance
    ref = jnp.maximum(x.reshape(-1, E) @ w1 + b1, 0.0) @ w2 + b2
    ref = ref.reshape(B, T, E)
    assert out.shape == (B, T, E)
    assert jnp.allclose(out, ref, atol=3e-2, rtol=3e-2), float(jnp.abs(out - ref).max())

    print("KERNEL_OK")
</pallas_src>

<mosaic_0001>
module attributes {stable_mosaic.version = 11 : i64} {
  func.func @ffn_kernel(%arg0: i32, %arg1: i32, %arg2: memref<16x128xbf16, #tpu.memory_space<vmem>>, %arg3: memref<128x128xbf16, #tpu.memory_space<vmem>>, %arg4: memref<1x128xf32, #tpu.memory_space<vmem>>, %arg5: memref<128x128xbf16, #tpu.memory_space<vmem>>, %arg6: memref<1x128xf32, #tpu.memory_space<vmem>>, %arg7: memref<16x128xf32, #tpu.memory_space<vmem>>, %arg8: memref<16x128xf32, #tpu.memory_space<vmem>>) attributes {dimension_semantics = [#tpu.dimension_semantics<parallel>, #tpu.dimension_semantics<arbitrary>], iteration_bounds = array<i64: 1, 1>, scalar_prefetch = 0 : i64, scratch_operands = 1 : i64, tpu.core_type = #tpu.core_type<tc>, window_params = [{transform_indices = @transform_0, window_bounds = array<i64: 16, 128>}, {transform_indices = @transform_1, window_bounds = array<i64: 128, 128>}, {transform_indices = @transform_2, window_bounds = array<i64: 1, 128>}, {transform_indices = @transform_3, window_bounds = array<i64: 128, 128>}, {pipeline_mode = #tpu.pipeline_mode<synchronous>, transform_indices = @transform_4, window_bounds = array<i64: 1, 128>}, {transform_indices = @transform_5, window_bounds = array<i64: 16, 128>}]} {
    %c0_i32 = arith.constant 0 : i32
    %0 = arith.cmpi eq, %arg1, %c0_i32 : i32
    %1 = arith.extui %0 : i1 to i32
    %c0_i32_0 = arith.constant 0 : i32
    %2 = arith.cmpi ne, %1, %c0_i32_0 : i32
    scf.if %2 {
      %c0_16 = arith.constant 0 : index
      %c0_17 = arith.constant 0 : index
      %20 = vector.load %arg6[%c0_16, %c0_17] : memref<1x128xf32, #tpu.memory_space<vmem>>, vector<1x128xf32>
      %21 = vector.shape_cast %20 : vector<1x128xf32> to vector<1x128xf32>
      %22 = vector.broadcast %21 : vector<1x128xf32> to vector<16x128xf32>
      %c0_18 = arith.constant 0 : index
      %c0_19 = arith.constant 0 : index
      %23 = vector.load %arg8[%c0_18, %c0_19] : memref<16x128xf32, #tpu.memory_space<vmem>>, vector<16x128xf32>
      tpu.vector_store %arg8[%c0_18, %c0_19], %22 {strides = array<i32>} : memref<16x128xf32, #tpu.memory_space<vmem>>, vector<16x128xf32>,
    } else {
    }
    %c0 = arith.constant 0 : index
    %c0_1 = arith.constant 0 : index
    %3 = vector.load %arg2[%c0, %c0_1] : memref<16x128xbf16, #tpu.memory_space<vmem>>, vector<16x128xbf16>
    %c0_2 = arith.constant 0 : index
    %c0_3 = arith.constant 0 : index
    %4 = vector.load %arg3[%c0_2, %c0_3] : memref<128x128xbf16, #tpu.memory_space<vmem>>, vector<128x128xbf16>
    %cst = arith.constant dense<0.000000e+00> : vector<16x128xf32>
    %5 = tpu.matmul %3, %4, %cst {dimension_numbers = #tpu.dot_dimension_numbers<[1], [0], [0], [1], [0, 0, 1, 1], [], []>} : vector<16x128xbf16>, vector<128x128xbf16>, vector<16x128xf32> -> vector<16x128xf32>
    %c0_4 = arith.constant 0 : index
    %c0_5 = arith.constant 0 : index
    %6 = vector.load %arg4[%c0_4, %c0_5] : memref<1x128xf32, #tpu.memory_space<vmem>>, vector<1x128xf32>
    %7 = vector.broadcast %6 : vector<1x128xf32> to vector<16x128xf32>
    %8 = arith.addf %5, %7 : vector<16x128xf32>
    %cst_6 = arith.constant 0.000000e+00 : f32
    %9 = vector.broadcast %cst_6 : f32 to vector<16x128xf32>
    %10 = arith.maximumf %8, %9 : vector<16x128xf32>
    %c0_7 = arith.constant 0 : index
    %c0_8 = arith.constant 0 : index
    %11 = vector.load %arg8[%c0_7, %c0_8] : memref<16x128xf32, #tpu.memory_space<vmem>>, vector<16x128xf32>
    %12 = arith.truncf %10 : vector<16x128xf32> to vector<16x128xbf16>
    %c0_9 = arith.constant 0 : index
    %c0_10 = arith.constant 0 : index
    %13 = vector.load %arg5[%c0_9, %c0_10] : memref<128x128xbf16, #tpu.memory_space<vmem>>, vector<128x128xbf16>
    %cst_11 = arith.constant dense<0.000000e+00> : vector<16x128xf32>
    %14 = tpu.matmul %12, %13, %cst_11 {dimension_numbers = #tpu.dot_dimension_numbers<[1], [0], [0], [1], [0, 0, 1, 1], [], []>} : vector<16x128xbf16>, vector<128x128xbf16>, vector<16x128xf32> -> vector<16x128xf32>
    %15 = arith.addf %11, %14 : vector<16x128xf32>
    %c0_12 = arith.constant 0 : index
    %c0_13 = arith.constant 0 : index
    %16 = vector.load %arg8[%c0_12, %c0_13] : memref<16x128xf32, #tpu.memory_space<vmem>>, vector<16x128xf32>
    tpu.vector_store %arg8[%c0_12, %c0_13], %15 {strides = array<i32>} : memref<16x128xf32, #tpu.memory_space<vmem>>, vector<16x128xf32>,
    %c0_i32_14 = arith.constant 0 : i32
    %17 = arith.cmpi eq, %arg1, %c0_i32_14 : i32
    %18 = arith.extui %17 : i1 to i32
    %c0_i32_15 = arith.constant 0 : i32
    %19 = arith.cmpi ne, %18, %c0_i32_15 : i32
    scf.if %19 {
      %c0_16 = arith.constant 0 : index
      %c0_17 = arith.constant 0 : index
      %20 = vector.load %arg8[%c0_16, %c0_17] : memref<16x128xf32, #tpu.memory_space<vmem>>, vector<16x128xf32>
      %c0_18 = arith.constant 0 : index
      %c0_19 = arith.constant 0 : index
      %21 = vector.load %arg7[%c0_18, %c0_19] : memref<16x128xf32, #tpu.memory_space<vmem>>, vector<16x128xf32>
      tpu.vector_store %arg7[%c0_18, %c0_19], %20 {strides = array<i32>} : memref<16x128xf32, #tpu.memory_space<vmem>>, vector<16x128xf32>,
    } else {
    }
    return
  }
  func.func @transform_0(%arg0: i32, %arg1: i32) -> (i32, i32) {
    %c0_i32 = arith.constant 0 : i32
    %c0_i32_0 = arith.constant 0 : i32
    return %arg0, %c0_i32 : i32, i32
  }
  func.func @transform_1(%arg0: i32, %arg1: i32) -> (i32, i32) {
    %c0_i32 = arith.constant 0 : i32
    %c0_i32_0 = arith.constant 0 : i32
    return %c0_i32, %arg1 : i32, i32
  }
  func.func @transform_2(%arg0: i32, %arg1: i32) -> (i32, i32) {
    %c0_i32 = arith.constant 0 : i32
    %c0_i32_0 = arith.constant 0 : i32
    return %c0_i32, %arg1 : i32, i32
  }
  func.func @transform_3(%arg0: i32, %arg1: i32) -> (i32, i32) {
    %c0_i32 = arith.constant 0 : i32
    %c0_i32_0 = arith.constant 0 : i32
    return %arg1, %c0_i32 : i32, i32
  }
  func.func @transform_4(%arg0: i32, %arg1: i32) -> (i32, i32) {
    %c0_i32 = arith.constant 0 : i32
    %c0_i32_0 = arith.constant 0 : i32
    %c0_i32_1 = arith.constant 0 : i32
    return %c0_i32, %c0_i32_0 : i32, i32
  }
  func.func @transform_5(%arg0: i32, %arg1: i32) -> (i32, i32) {
    %c0_i32 = arith.constant 0 : i32
    %c0_i32_0 = arith.constant 0 : i32
    return %arg0, %c0_i32 : i32, i32
  }
}

</mosaic_0001>

<bundles_post_ra>
// kernel: tpu_custom_call.1
= control target key start
LH: loop header
LB: loop body
LE: loop exit
PB: predicated region body
PF: predicated region fallthrough
CT: control target
= control target key end

     0   :  { %10 = vsyncpa [#allocation4], 0  ;;  %s583_s0 = inlined_call_operand.hbm [shape: bf16[16,128], index: 0, kind: input, shape index: {}]   ;;  %s584_s1 = inlined_call_operand.hbm [shape: bf16[128,128], index: 1, kind: input, shape index: {}]   ;;  %s585_s2 = inlined_call_operand.vmem [shape: f32[1,128], index: 2, kind: input, shape index: {}]   ;;  %s586_s3 = inlined_call_operand.hbm [shape: bf16[128,128], index: 3, kind: input, shape index: {}]   ;;  %s587_s4 = inlined_call_operand.vmem [shape: f32[1,128], index: 4, kind: input, shape index: {}]   ;;  %s588_s5 = inlined_call_operand.hbm [shape: f32[16,128], index: 5, kind: output, shape index: {}]  }
   0x1   :  { %11 = vsyncpa [#allocation7], 0 }
   0x2   :  { %12 = vsyncpa [#allocation5], 0  ;;  %s525_s18 = smov [#allocation6]   ;;  %s526_s20 = smov [#allocation3]  }
   0x3   :  { %s30_s19 = sshll.u32 %s525_s18, 4  ;;  %s18_s21 = sshll.u32 %s526_s20, 4  ;;  %s31_s19 = int_to_ptr.vmem [resolvable:$true] %s30_s19  ;;  %s19_s21 = int_to_ptr.vmem [resolvable:$true] %s18_s21 }
   0x4   :  { %s447_s22 = scalar_lea.vmem %s31_s19, 1024  ;;  %p452_p1 = scmp.lt.s32.totalorder %s31_s19, %s31_s19 }
   0x5   :  { %p448_p0 = scmp.ne.s32.totalorder %s31_s19, %s447_s22  ;;  %p453_p2 = scmp.lt.s32.totalorder %s447_s22, %s447_s22 }
   0x7   :  { %p454_p3 = por %p453_p2, %p452_p1 }
   0x9   :  { %p455_p4 = pnand %p454_p3, %p448_p0 }
   0xb   :  { %458 = shalt.err (!%p455_p4)
}
   0xc   :  { %s527_s23 = smov 64   ;;  %s528_s24 = smov 4  }
   0xd   :  { %36 = dma.hbm_to_vmem [thread:$0]  %s584_s1, 1024, %s31_s19, [#allocation7], %s527_s23, %s527_s23, %s528_s24  }
   0xe   :  { %s467_s27 = scalar_lea.vmem %s19_s21, 128  ;;  %p472_p6 = scmp.lt.s32.totalorder %s19_s21, %s19_s21 }
   0xf   :  { %p468_p5 = scmp.ne.s32.totalorder %s19_s21, %s467_s27  ;;  %p473_p7 = scmp.lt.s32.totalorder %s467_s27, %s467_s27 }
  0x11   :  { %p474_p8 = por %p473_p7, %p472_p6 }
  0x13   :  { %p475_p9 = pnand %p474_p8, %p468_p5 }
  0x15   :  { %478 = shalt.err (!%p475_p9)
}
  0x16   :  { %24 = dma.hbm_to_vmem [thread:$0]  %s583_s0, 128, %s19_s21, [#allocation4], %s527_s23, %s527_s23, %s528_s24  }
  0x17   :  { %s529_s30 = smov [#allocation8]  }
  0x18   :  { %s44_s6 = sshll.u32 %s529_s30, 4  ;;  %s45_s6 = int_to_ptr.vmem [resolvable:$true] %s44_s6 }
  0x19   :  { %s487_s7 = scalar_lea.vmem %s45_s6, 1024  ;;  %p492_p11 = scmp.lt.s32.totalorder %s45_s6, %s45_s6 }
  0x1a   :  { %p488_p10 = scmp.ne.s32.totalorder %s45_s6, %s487_s7  ;;  %p493_p12 = scmp.lt.s32.totalorder %s487_s7, %s487_s7 }
  0x1c   :  { %p494_p13 = por %p493_p12, %p492_p11 }
  0x1e   :  { %p495_p0 = pnand %p494_p13, %p488_p10 }
  0x20   :  { %498 = shalt.err (!%p495_p0)
}
  0x21   :  { %50 = dma.hbm_to_vmem [thread:$0]  %s586_s3, 1024, %s45_s6, [#allocation7], %s527_s23, %s527_s23, %s528_s24  }
  0x22   :  { %519 = dma.done.wait [#allocation4], 128  }
  0x23   :  { %520 = vsyncadd [#allocation4], 4294967168 }
  0x24   :  { %521 = dma.done.wait [#allocation7], 2048  }
  0x25   :  { %522 = vsyncadd [#allocation7], 4294965248  ;;  %v530_v0 = vmov 0.0   ;;  %vm531_vm0 = vmmov 0   ;;  %v422_v1 = vld [vmem:[#allocation6 + $0x38] sm:$0xff]   ;;  %v423_v2 = vld [vmem:[#allocation6 + $0x30] sm:$0xff]  }
  0x26   :  { %372 = vmatprep.subr.bf16.mxu0 %v530_v0  ;;  %388 = vmatprep.mubr.msk.bf16.mxu0 %vm531_vm0, %v530_v0  ;;  %v424_v3 = vld [vmem:[#allocation6 + $0x28] sm:$0xff]   ;;  %v431_v4 = vld [vmem:[#allocation8 + $0x38] sm:$0xff]   ;;  %v425_v5 = vld [vmem:[#allocation6 + $0x20] sm:$0xff]   ;;  %s532_s11 = smov [#allocation9]  }
  0x27   :  { %392 = vmatprep.subr.bf16.mxu1 %v530_v0  ;;  %408 = vmatprep.mubr.msk.bf16.mxu1 %vm531_vm0, %v530_v0  ;;  %v432_v6 = vld [vmem:[#allocation8 + $0x30] sm:$0xff]   ;;  %v426_v7 = vld [vmem:[#allocation6 + $0x18] sm:$0xff]   ;;  %v433_v8 = vld [vmem:[#allocation8 + $0x28] sm:$0xff]   ;;  %s322_s12 = sshll.u32 %s532_s11, 4  ;;  %s323_s12 = int_to_ptr.vmem [resolvable:$true] %s322_s12 }
  0x28   :  { %373 = vmatpush3.bf16.msra.mxu0 %v422_v1  ;;  %393 = vmatpush3.bf16.msra.mxu1 %v431_v4  ;;  %v427_v9 = vld [vmem:[#allocation6 + $0x10] sm:$0xff]   ;;  %v434_v10 = vld [vmem:[#allocation8 + $0x20] sm:$0xff]   ;;  %v428_v11 = vld [vmem:[#allocation6 + $0x8] sm:$0xff]   ;;  %p504_p2 = scmp.lt.s32.totalorder %s323_s12, %s323_s12 }
  0x29   :  { %374 = vmatprep.subr.bf16.mxu0 %v530_v0  ;;  %394 = vmatprep.subr.bf16.mxu1 %v530_v0  ;;  %v435_v12 = vld [vmem:[#allocation8 + $0x18] sm:$0xff]   ;;  %v429_v13 = vld [vmem:[#allocation6] sm:$0xff]   ;;  %v436_v15 = vld [vmem:[#allocation8 + $0x10] sm:$0xff]  }
  0x2a   :  { %v430_v14 = vld [vmem:[#allocation3] sm:$0xff]   ;;  %v437_v16 = vld [vmem:[#allocation8 + $0x8] sm:$0xff]   ;;  %v438_v17 = vld [vmem:[#allocation8] sm:$0xff]  }
  0x2b   :  { %v336_v18 = vld [vmem:[%s585_s2] ss:$0 sm:$0xff]  ;;  %s499_s2 = scalar_lea.vmem %s323_s12, 256 }
  0x2c   :  { %375 = vmatpush3.bf16.msra.mxu0 %v423_v2  ;;  %395 = vmatpush3.bf16.msra.mxu1 %v432_v6  ;;  %v335_v28 = vld [vmem:[%s587_s4] ss:$0 sm:$0xff]  ;;  %p500_p1 = scmp.ne.s32.totalorder %s323_s12, %s499_s2  ;;  %p505_p3 = scmp.lt.s32.totalorder %s499_s2, %s499_s2 }
  0x2d   :  { %376 = vmatprep.subr.bf16.mxu0 %v530_v0  ;;  %396 = vmatprep.subr.bf16.mxu1 %v530_v0 }
  0x2e   :  { %p506_p4 = por %p505_p3, %p504_p2 }
  0x30   :  { %377 = vmatpush3.bf16.msra.mxu0 %v424_v3  ;;  %397 = vmatpush3.bf16.msra.mxu1 %v433_v8  ;;  %p507_p5 = pnand %p506_p4, %p500_p1 }
  0x31   :  { %378 = vmatprep.subr.bf16.mxu0 %v530_v0  ;;  %398 = vmatprep.subr.bf16.mxu1 %v530_v0 }
  0x34   :  { %379 = vmatpush3.bf16.msra.mxu0 %v425_v5  ;;  %399 = vmatpush3.bf16.msra.mxu1 %v434_v10 }
  0x35   :  { %380 = vmatprep.subr.bf16.mxu0 %v530_v0  ;;  %400 = vmatprep.subr.bf16.mxu1 %v530_v0 }
  0x38   :  { %381 = vmatpush3.bf16.msra.mxu0 %v426_v7  ;;  %401 = vmatpush3.bf16.msra.mxu1 %v435_v12 }
  0x39   :  { %382 = vmatprep.subr.bf16.mxu0 %v530_v0  ;;  %402 = vmatprep.subr.bf16.mxu1 %v530_v0 }
  0x3c   :  { %383 = vmatpush3.bf16.msra.mxu0 %v427_v9  ;;  %403 = vmatpush3.bf16.msra.mxu1 %v436_v15 }
  0x3d   :  { %384 = vmatprep.subr.bf16.mxu0 %v530_v0  ;;  %404 = vmatprep.subr.bf16.mxu1 %v530_v0 }
  0x40   :  { %385 = vmatpush3.bf16.msra.mxu0 %v428_v11  ;;  %405 = vmatpush3.bf16.msra.mxu1 %v437_v16 }
  0x41   :  { %386 = vmatprep.subr.bf16.mxu0 %v530_v0  ;;  %406 = vmatprep.subr.bf16.mxu1 %v530_v0 }
  0x44   :  { %387 = vmatpush3.bf16.msra.mxu0 %v429_v13  ;;  %407 = vmatpush3.bf16.msra.mxu1 %v438_v17 }
  0x47   :  { %389 = vmatmul.mubr.bf16.vlgmr.msra.gmra.mxu0 %v430_v14 }
 0x107   :  { %v189_v19 = vpop.f32.mrf.mxu0 }
 0x108   :  { %v190_v21 = vadd.f32 %v336_v18, %v189_v19 }
 0x109   :  { %v390_v20 = vpop.f32.mrf.mxu0 }
 0x10a   :  { %v196_v25 = vmax.f32 %v190_v21, 0.0 }
 0x10b   :  { %v192_v22 = vpop.f32.mrf.mxu0 }
 0x10c   :  { %v193_v23 = vadd.f32 %v336_v18, %v192_v22 }
 0x10d   :  { %v391_v24 = vpop.f32.mrf.mxu0 }
 0x10e   :  { %v197_v26 = vmax.f32 %v193_v23, 0.0 }
 0x110   :  { %v200_v27 = vpack.c.bf16 %v197_v26, %v196_v25 }
 0x112   :  { %409 = vmatmul.mubr.bf16.vlgmr.msra.gmra.mxu1 %v200_v27 }
 0x1d2   :  { %v299_v29 = vpop.f32.mrf.mxu1 }
 0x1d3   :  { %v306_v30 = vadd.f32 %v335_v28, %v299_v29 }
 0x1d4   :  { %v410_v31 = vpop.f32.mrf.mxu1 }
 0x1d5   :  { %315 = vst [vmem:[#allocation9] sm:$0xff] %v306_v30 }
 0x1d6   :  { %v302_v32 = vpop.f32.mrf.mxu1 }
 0x1d7   :  { %v307_v33 = vadd.f32 %v335_v28, %v302_v32 }
 0x1d8   :  { %v411_v34 = vpop.f32.mrf.mxu1 }
 0x1d9   :  { %316 = vst [vmem:[#allocation9 + $0x8] sm:$0xff] %v307_v33 }
 0x1da   :  { %510 = shalt.err (!%p507_p5)
}
 0x1db   :  { %s533_s13 = smov 128   ;;  %s534_s4 = smov 8  }
 0x1dc   :  { %328 = dma.vmem_to_hbm [thread:$0]  %s323_s12, 256, %s588_s5, [#allocation5], %s533_s13, %s533_s13, %s534_s4  }
 0x1dd   :  { %523 = dma.done.wait [#allocation5], 256  }
 0x1de   :  { %524 = vsyncadd [#allocation5], 4294967040 }
 0x1df   :  { %332 = vsyncpa [#allocation4], 1 }
 0x1e0   :  { %333 = vsyncpa [#allocation7], 1 }
 0x1e1   :  { %334 = vsyncpa [#allocation5], 1 }

</bundles_post_ra>
